<compile_context>
chip_gen: v6e
topology: v6e:2x2x1
jax: 0.10.0
libtpu: 0.0.40
codegen_flags: <defaults>
</compile_context>

<pallas_src>
import functools

import jax
import jax.numpy as jnp
from jax.experimental import pallas as pl
from jax.experimental.pallas import tpu as pltpu

_LANES = 128
_ACC_ROWS = 256  # fixed accumulator height (decoupled from tile_rows)


def _num_tensorcores() -> int:
    """Best-effort TensorCore-per-chip count (2 on v7x, 1 on v5e/v6e)."""
    try:
        info = pltpu.get_tpu_info()
        for attr in ("num_cores", "num_tensorcores", "tensorcores_per_chip",
                     "cores_per_chip"):
            v = getattr(info, attr, None)
            if isinstance(v, int) and v > 0:
                return int(v)
    except Exception:
        pass
    try:
        kind = jax.devices()[0].device_kind.lower()
        if "v7" in kind or "7x" in kind:
            return 2
    except Exception:
        pass
    return 1


def _ssd_kernel(a_ref, b_ref, out_ref, acc_ref, *,
                rows, nblocks, acc_rows, mask_tail):
    """Per-core partial sum of squared differences (SSD)."""
    p = pl.program_id(0)      # parallel (core) axis
    j = pl.program_id(1)      # arbitrary (reduction / chunk) axis
    nj = pl.num_programs(1)

    @pl.when(j == 0)
    def _init():
        acc_ref[...] = jnp.zeros_like(acc_ref)

    tile_rows = a_ref.shape[0]
    k = tile_rows // acc_rows

    d = a_ref[...].astype(jnp.float32) - b_ref[...].astype(jnp.float32)
    sq = d * d

    def _accumulate(vals):
        # Partial reduce (tile_rows,128) -> (acc_rows,128): leading-axis adds
        # only (no cross-lane work), then one small accumulator update.
        acc_ref[...] += vals.reshape(k, acc_rows, _LANES).sum(axis=0)

    if mask_tail:
        blk = p * nj + j
        is_tail = blk >= (nblocks - 1)

        @pl.when(jnp.logical_not(is_tail))
        def _interior():
            _accumulate(sq)

        @pl.when(is_tail)
        def _tail():
            # Covers both the partial last block and fully-out-of-range
            # logical blocks (whose DMA index was clamped in the index_map);
            # any garbage/NaN in those rows is discarded by the where.
            row_ids = blk * tile_rows + jax.lax.broadcasted_iota(
                jnp.int32, (tile_rows, 1), 0)
            _accumulate(jnp.where(row_ids < rows, sq, 0.0))
    else:
        _accumulate(sq)

    @pl.when(j == nj - 1)
    def _finalize():
        # Single small cross-lane reduction per core, off the hot loop.
        out_ref[...] = jnp.sum(acc_ref[...]).reshape(out_ref.shape)


def psnr_pallas(img1, img2, *, tile_rows=8192):
    """Computes 20*log10(40/sqrt(mean((img1-img2)^2))) with a Pallas kernel."""
    assert img1.shape == img2.shape, "img1 and img2 must have the same shape"
    assert tile_rows > 0 and tile_rows % 8 == 0
    n = img1.size

    # Flatten (free, contiguous reshape); keep native dtype (cast is in-kernel).
    a = img1.reshape(-1)
    b = img2.reshape(-1)

    rem = n % _LANES
    if rem:
        # TODO(synk): rare path (n not a multiple of 128) still materializes
        # one padded copy of each input; typical image tensors are
        # lane-aligned so this never triggers.
        pad = _LANES - rem
        a = jnp.pad(a, (0, pad))
        b = jnp.pad(b, (0, pad))

    rows = a.size // _LANES
    a2 = a.reshape(rows, _LANES)
    b2 = b.reshape(rows, _LANES)

    tr = min(tile_rows, rows)               # block rows (multiple of 8 or full)
    nblocks = pl.cdiv(rows, tr)             # logical row-blocks
    ncores = max(1, min(_num_tensorcores(), nblocks))
    j_steps = pl.cdiv(nblocks, ncores)      # reduction steps per core

    # Fixed small accumulator unless the (small) tile can't be split evenly.
    acc_rows = _ACC_ROWS if (tr % _ACC_ROWS == 0) else tr
    # Compile the mask branch out entirely when the row range divides evenly.
    mask_tail = (rows % tr != 0) or (ncores * j_steps != nblocks)

    def in_map(p, j):
        # Clamp so out-of-range logical blocks re-read a valid block; their
        # contribution is zeroed by the in-kernel row mask.
        return (jnp.minimum(p * j_steps + j, nblocks - 1), 0)

    kernel = functools.partial(_ssd_kernel, rows=rows, nblocks=nblocks,
                               acc_rows=acc_rows, mask_tail=mask_tail)

    # VMEM budget: 2 inputs x 2 pipeline buffers x one block, plus the small
    # accumulator; ask for at least 32 MiB so big tiles don't hit the scoped
    # default on v5e (16 MiB).
    itemsize = max(jnp.dtype(a2.dtype).itemsize, jnp.dtype(b2.dtype).itemsize)
    vmem_need = 2 * 2 * tr * _LANES * itemsize + acc_rows * _LANES * 4
    vmem_limit = int(max(32 << 20, vmem_need + (8 << 20)))

    cost = pl.CostEstimate(
        flops=3 * n,
        transcendentals=0,
        bytes_accessed=n * (jnp.dtype(img1.dtype).itemsize
                            + jnp.dtype(img2.dtype).itemsize) + 4 * ncores,
    )

    ssd_parts = pl.pallas_call(
        kernel,
        out_shape=jax.ShapeDtypeStruct((ncores, 1, 1), jnp.float32),
        grid_spec=pltpu.PrefetchScalarGridSpec(
            num_scalar_prefetch=0,
            grid=(ncores, j_steps),
            in_specs=[
                pl.BlockSpec((tr, _LANES), in_map),
                pl.BlockSpec((tr, _LANES), in_map),
            ],
            out_specs=pl.BlockSpec((1, 1, 1), lambda p, j: (p, 0, 0)),
            scratch_shapes=[pltpu.VMEM((acc_rows, _LANES), jnp.float32)],
        ),
        compiler_params=pltpu.CompilerParams(
            dimension_semantics=("parallel", "arbitrary"),
            vmem_limit_bytes=vmem_limit,
        ),
        cost_estimate=cost,
    )(a2, b2)

    # Combine per-core partials and do the scalar transform in the wrapper.
    ssd = jnp.sum(ssd_parts)
    mse = ssd / jnp.float32(n)
    # Note: mse == 0 (identical images) yields +inf, matching the reference.
    return 20.0 * jnp.log10(40.0 / jnp.sqrt(mse))


def psnr_ref(img1, img2):
    mse = jnp.mean((img1.astype(jnp.float32) - img2.astype(jnp.float32)) ** 2)
    return 20.0 * jnp.log10(40.0 / jnp.sqrt(mse))


if __name__ == "__main__":
    key = jax.random.PRNGKey(0)
    k1, k2 = jax.random.split(key)
    # NCHW images with range ~[0, 255]
    img1 = jax.random.uniform(k1, (2, 4, 16, 16), jnp.float32) * 255.0
    img2 = jax.random.uniform(k2, (2, 4, 16, 16), jnp.float32) * 255.0

    out = psnr_pallas(img1, img2)
    jax.block_until_ready(out)

    expected = psnr_ref(img1, img2)
    assert jnp.allclose(out, expected, rtol=1e-5, atol=1e-5), (out, expected)
    print("KERNEL_OK")
</pallas_src>

<mosaic_0001>
module attributes {stable_mosaic.version = 11 : i64} {
  func.func @_ssd_kernel(%arg0: i32, %arg1: i32, %arg2: memref<16x128xf32, #tpu.memory_space<vmem>>, %arg3: memref<16x128xf32, #tpu.memory_space<vmem>>, %arg4: memref<1x1x1xf32, #tpu.memory_space<vmem>>, %arg5: memref<16x128xf32, #tpu.memory_space<vmem>>) attributes {dimension_semantics = [#tpu.dimension_semantics<parallel>, #tpu.dimension_semantics<arbitrary>], iteration_bounds = array<i64: 1, 1>, scalar_prefetch = 0 : i64, scratch_operands = 1 : i64, tpu.core_type = #tpu.core_type<tc>, window_params = [{transform_indices = @transform_0, window_bounds = array<i64: 16, 128>}, {transform_indices = @transform_1, window_bounds = array<i64: 16, 128>}, {transform_indices = @transform_2, window_bounds = array<i64: 1, 1, 1>}]} {
    %c0_i32 = arith.constant 0 : i32
    %0 = arith.cmpi eq, %arg1, %c0_i32 : i32
    %1 = arith.extui %0 : i1 to i32
    %c0_i32_0 = arith.constant 0 : i32
    %2 = arith.cmpi ne, %1, %c0_i32_0 : i32
    scf.if %2 {
      %cst_10 = arith.constant 0.000000e+00 : f32
      %15 = vector.broadcast %cst_10 : f32 to vector<16x128xf32>
      %c0_11 = arith.constant 0 : index
      %c0_12 = arith.constant 0 : index
      %16 = vector.load %arg5[%c0_11, %c0_12] : memref<16x128xf32, #tpu.memory_space<vmem>>, vector<16x128xf32>
      tpu.vector_store %arg5[%c0_11, %c0_12], %15 {strides = array<i32>} : memref<16x128xf32, #tpu.memory_space<vmem>>, vector<16x128xf32>,
    } else {
    }
    %c0 = arith.constant 0 : index
    %c0_1 = arith.constant 0 : index
    %3 = vector.load %arg2[%c0, %c0_1] : memref<16x128xf32, #tpu.memory_space<vmem>>, vector<16x128xf32>
    %c0_2 = arith.constant 0 : index
    %c0_3 = arith.constant 0 : index
    %4 = vector.load %arg3[%c0_2, %c0_3] : memref<16x128xf32, #tpu.memory_space<vmem>>, vector<16x128xf32>
    %5 = arith.subf %3, %4 : vector<16x128xf32>
    %6 = arith.mulf %5, %5 : vector<16x128xf32>
    %c0_4 = arith.constant 0 : index
    %c0_5 = arith.constant 0 : index
    %7 = vector.load %arg5[%c0_4, %c0_5] : memref<16x128xf32, #tpu.memory_space<vmem>>, vector<16x128xf32>
    %8 = vector.shape_cast %6 : vector<16x128xf32> to vector<1x16x128xf32>
    %cst = arith.constant dense<0.000000e+00> : vector<16x128xf32>
    %9 = vector.multi_reduction <add>, %8, %cst [0] : vector<1x16x128xf32> to vector<16x128xf32>
    %10 = arith.addf %7, %9 : vector<16x128xf32>
    %c0_6 = arith.constant 0 : index
    %c0_7 = arith.constant 0 : index
    %11 = vector.load %arg5[%c0_6, %c0_7] : memref<16x128xf32, #tpu.memory_space<vmem>>, vector<16x128xf32>
    tpu.vector_store %arg5[%c0_6, %c0_7], %10 {strides = array<i32>} : memref<16x128xf32, #tpu.memory_space<vmem>>, vector<16x128xf32>,
    %c0_i32_8 = arith.constant 0 : i32
    %12 = arith.cmpi eq, %arg1, %c0_i32_8 : i32
    %13 = arith.extui %12 : i1 to i32
    %c0_i32_9 = arith.constant 0 : i32
    %14 = arith.cmpi ne, %13, %c0_i32_9 : i32
    scf.if %14 {
      %c0_10 = arith.constant 0 : index
      %c0_11 = arith.constant 0 : index
      %15 = vector.load %arg5[%c0_10, %c0_11] : memref<16x128xf32, #tpu.memory_space<vmem>>, vector<16x128xf32>
      %16 = vector.shape_cast %15 : vector<16x128xf32> to vector<1x16x128xf32>
      %cst_12 = arith.constant dense<0.000000e+00> : vector<1xf32>
      %17 = vector.multi_reduction <add>, %16, %cst_12 [1, 2] : vector<1x16x128xf32> to vector<1xf32>
      %18 = vector.shape_cast %17 : vector<1xf32> to vector<1x1x1xf32>
      %19 = vector.extract %18[0, 0, 0] : f32 from vector<1x1x1xf32>
      %20 = vector.broadcast %19 : f32 to vector<1x1x1xf32>
      %c0_13 = arith.constant 0 : index
      %c0_14 = arith.constant 0 : index
      %c0_15 = arith.constant 0 : index
      %21 = vector.load %arg4[%c0_13, %c0_14, %c0_15] : memref<1x1x1xf32, #tpu.memory_space<vmem>>, vector<1x1x1xf32>
      tpu.vector_store %arg4[%c0_13, %c0_14, %c0_15], %20 {strides = array<i32>} : memref<1x1x1xf32, #tpu.memory_space<vmem>>, vector<1x1x1xf32>,
    } else {
    }
    return
  }
  func.func @transform_0(%arg0: i32, %arg1: i32) -> (i32, i32) {
    %c1_i32 = arith.constant 1 : i32
    %0 = arith.muli %arg0, %c1_i32 : i32
    %1 = arith.addi %0, %arg1 : i32
    %c0_i32 = arith.constant 0 : i32
    %2 = arith.minsi %1, %c0_i32 : i32
    %c0_i32_0 = arith.constant 0 : i32
    %c0_i32_1 = arith.constant 0 : i32
    return %2, %c0_i32_0 : i32, i32
  }
  func.func @transform_1(%arg0: i32, %arg1: i32) -> (i32, i32) {
    %c1_i32 = arith.constant 1 : i32
    %0 = arith.muli %arg0, %c1_i32 : i32
    %1 = arith.addi %0, %arg1 : i32
    %c0_i32 = arith.constant 0 : i32
    %2 = arith.minsi %1, %c0_i32 : i32
    %c0_i32_0 = arith.constant 0 : i32
    %c0_i32_1 = arith.constant 0 : i32
    return %2, %c0_i32_0 : i32, i32
  }
  func.func @transform_2(%arg0: i32, %arg1: i32) -> (i32, i32, i32) {
    %c0_i32 = arith.constant 0 : i32
    %c0_i32_0 = arith.constant 0 : i32
    %c0_i32_1 = arith.constant 0 : i32
    return %arg0, %c0_i32, %c0_i32_0 : i32, i32, i32
  }
}

</mosaic_0001>

<bundles_post_ra>
// kernel: tpu_custom_call.1
= control target key start
LH: loop header
LB: loop body
LE: loop exit
PB: predicated region body
PF: predicated region fallthrough
CT: control target
= control target key end

     0   :  { %7 = vsyncpa [#allocation4], 0  ;;  %s222_s0 = inlined_call_operand.hbm [shape: f32[16,128], index: 0, kind: input, shape index: {}]   ;;  %s223_s1 = inlined_call_operand.hbm [shape: f32[16,128], index: 1, kind: input, shape index: {}]   ;;  %s224_s2 = inlined_call_operand.hbm [shape: f32[1,1,1], index: 2, kind: output, shape index: {}]  }
   0x1   :  { %8 = vsyncpa [#allocation7], 0 }
   0x2   :  { %9 = vsyncpa [#allocation5], 0  ;;  %s193_s9 = smov [#allocation3]  }
   0x3   :  { %s21_s10 = sshll.u32 %s193_s9, 4  ;;  %s22_s10 = int_to_ptr.vmem [resolvable:$true] %s21_s10 }
   0x4   :  { %s135_s11 = scalar_lea.vmem %s22_s10, 256  ;;  %p140_p1 = scmp.lt.s32.totalorder %s22_s10, %s22_s10 }
   0x5   :  { %p136_p0 = scmp.ne.s32.totalorder %s22_s10, %s135_s11  ;;  %p141_p2 = scmp.lt.s32.totalorder %s135_s11, %s135_s11 }
   0x7   :  { %p142_p3 = por %p141_p2, %p140_p1 }
   0x9   :  { %p143_p4 = pnand %p142_p3, %p136_p0 }
   0xb   :  { %146 = shalt.err (!%p143_p4)
}
   0xc   :  { %s194_s12 = smov 128   ;;  %s195_s13 = smov 8  }
   0xd   :  { %27 = dma.hbm_to_vmem [thread:$0]  %s222_s0, 256, %s22_s10, [#allocation4], %s194_s12, %s194_s12, %s195_s13  }
   0xe   :  { %s196_s16 = smov [#allocation6]  }
   0xf   :  { %s39_s17 = sshll.u32 %s196_s16, 4  ;;  %s40_s17 = int_to_ptr.vmem [resolvable:$true] %s39_s17 }
  0x10   :  { %s155_s18 = scalar_lea.vmem %s40_s17, 256  ;;  %p160_p6 = scmp.lt.s32.totalorder %s40_s17, %s40_s17 }
  0x11   :  { %p156_p5 = scmp.ne.s32.totalorder %s40_s17, %s155_s18  ;;  %p161_p7 = scmp.lt.s32.totalorder %s155_s18, %s155_s18 }
  0x13   :  { %p162_p8 = por %p161_p7, %p160_p6 }
  0x15   :  { %p163_p9 = pnand %p162_p8, %p156_p5 }
  0x17   :  { %166 = shalt.err (!%p163_p9)
}
  0x18   :  { %45 = dma.hbm_to_vmem [thread:$0]  %s223_s1, 256, %s40_s17, [#allocation7], %s194_s12, %s194_s12, %s195_s13  }
  0x19   :  { %187 = dma.done.wait [#allocation4], 256  }
  0x1a   :  { %188 = vsyncadd [#allocation4], 4294967040 }
  0x1b   :  { %189 = dma.done.wait [#allocation7], 256  }
  0x1c   :  { %190 = vsyncadd [#allocation7], 4294967040  ;;  %v66_v0 = vld [vmem:[#allocation3] sm:$0xff]  ;;  %v67_v1 = vld [vmem:[#allocation3 + $0x8] sm:$0xff]  ;;  %s197_s0 = smov [#allocation8]   ;;  %vm98_vm0 = vcmask 0  }
  0x1d   :  { %v68_v2 = vld [vmem:[#allocation6] sm:$0xff]  ;;  %v69_v3 = vld [vmem:[#allocation6 + $0x8] sm:$0xff]  ;;  %s106_s1 = sshll.u32 %s197_s0, 4  ;;  %s107_s1 = int_to_ptr.vmem [resolvable:$true] %s106_s1 }
  0x1e   :  { %v70_v4 = vsub.f32 %v66_v0, %v68_v2  ;;  %v71_v5 = vsub.f32 %v67_v1, %v69_v3  ;;  %s167_s22 = scalar_lea.vmem %s107_s1, 16  ;;  %s171_s23 = scalar_lea.vmem %s107_s1, 32 }
  0x1f   :  { %p168_p10 = scmp.ne.s32.totalorder %s107_s1, %s167_s22  ;;  %p172_p11 = scmp.lt.s32.totalorder %s107_s1, %s107_s1 }
  0x20   :  { %v72_v6 = vmul.f32 %v70_v4, %v70_v4  ;;  %v73_v7 = vmul.f32 %v71_v5, %v71_v5  ;;  %p173_p12 = scmp.lt.s32.totalorder %s171_s23, %s167_s22 }
  0x22   :  { %v87_v8 = vadd.f32 %v73_v7, %v72_v6  ;;  %p174_p13 = por %p173_p12, %p172_p11 }
  0x24   :  { %88 = vadd.xlane.f32.xlu0 %v87_v8  ;;  %p175_p0 = pnand %p174_p13, %p168_p10 }
  0xad   :  { %v89_v9 = vpop.xlane.xlu0 %88 }
  0xae   :  { %v90_v10 = vrot.slane %v89_v9, 4 }
  0xb0   :  { %v91_v11 = vadd.f32 %v90_v10, %v89_v9 }
  0xb2   :  { %v92_v12 = vrot.slane %v91_v11, 2 }
  0xb4   :  { %v93_v13 = vadd.f32 %v92_v12, %v91_v11 }
  0xb6   :  { %v94_v14 = vrot.slane %v93_v13, 1 }
  0xb8   :  { %v95_v15 = vadd.f32 %v94_v14, %v93_v13 }
  0xba   :  { %120 = vpush %v95_v15 }
  0xeb   :  { %s121_s21 = spop %120 }
  0xec   :  { %v97_v16 = vstv %s121_s21 }
  0xed   :  { %99 = vst.msk [vmem:[#allocation8] sm:$0x1] %vm98_vm0, %v97_v16 }
  0xee   :  { %178 = shalt.err (!%p175_p0)
}
  0xef   :  { %109 = dma.vmem_to_hbm [thread:$0]  %s107_s1, 16, %s224_s2, [#allocation5]  }
  0xf0   :  { %191 = dma.done.wait [#allocation5], 16  }
  0xf1   :  { %192 = vsyncadd [#allocation5], 4294967280 }
  0xf2   :  { %113 = vsyncpa [#allocation4], 1 }
  0xf3   :  { %114 = vsyncpa [#allocation7], 1 }
  0xf4   :  { %115 = vsyncpa [#allocation5], 1 }

</bundles_post_ra>
